<compile_context>
chip_gen: v7x
topology: tpu7x:2x2x1
jax: 0.10.0
libtpu: 0.0.40
codegen_flags: <defaults>
</compile_context>

<pallas_src>
import math
import functools

import jax
import jax.numpy as jnp
from jax.experimental import pallas as pl
from jax.experimental.pallas import tpu as pltpu

_LN2 = math.log(2.0)
_C1 = 3.0 / (4.0 * _LN2) / math.pow(2.0, 1.0 / 3.0)   # 3 / 4 / ln2 / 2^(1/3)
_C2 = 3.0 / (2.0 * _LN2)                              # 3 / 2 / ln2
_LN_BASE = (4.0 / 3.0) * _LN2                         # ln(2^(4/3))

_LANES = 128
_SUBLANES = 8
_MAX_TILE_R = 1024        # 8*1024*128*4 B = 4 MiB input block (safe on v5e/v6e/v7x)
_XLA_FALLBACK_N = 4096    # below this, fixed repack + dispatch overhead dominates


# ----------------------------------------------------------------------------
# Kernel-side math (shared by both kernel variants)
# ----------------------------------------------------------------------------
def _iou_loss_from_packed(packed_ref, eps):
    # packed_ref block: (8, tile_r, 128); rows = px1,py1,px2,py2,tx1,ty1,tx2,ty2
    px1 = packed_ref[0]
    py1 = packed_ref[1]
    px2 = packed_ref[2]
    py2 = packed_ref[3]
    tx1 = packed_ref[4]
    ty1 = packed_ref[5]
    tx2 = packed_ref[6]
    ty2 = packed_ref[7]

    # bbox_overlaps(..., is_aligned=True, mode='iou')
    area_p = (px2 - px1) * (py2 - py1)
    area_t = (tx2 - tx1) * (ty2 - ty1)
    w = jnp.maximum(jnp.minimum(px2, tx2) - jnp.maximum(px1, tx1), 0.0)
    h = jnp.maximum(jnp.minimum(py2, ty2) - jnp.maximum(py1, ty1), 0.0)
    overlap = w * h
    union = jnp.maximum(area_p + area_t - overlap, eps)
    ious = overlap / union

    # b4iou: where(iou < 0.25, 1 - iou,
    #              3/(4 ln2 2^(1/3)) * (2^(4/3))**iou - 2 iou + 2 - 3/(2 ln2))
    low = 1.0 - ious
    high = _C1 * jnp.exp(ious * _LN_BASE) - 2.0 * ious + (2.0 - _C2)
    return jnp.where(ious < 0.25, low, high)            # (tile_r, 128) dense


def _b4iou_perbox_kernel(packed_ref, loss_ref, *, eps):
    # Dense per-box variant: only used for 'none' / weighted paths.
    loss_ref[...] = _iou_loss_from_packed(packed_ref, eps)


def _b4iou_sum_kernel(packed_ref, psum_ref, *, eps, tile_r):
    # Mean/sum-only variant: no per-box store at all.  Padded (all-zero) boxes
    # contribute exactly 1.0 each; the wrapper corrects for them.
    loss = _iou_loss_from_packed(packed_ref, eps)
    psum_ref[0] = jnp.sum(loss.reshape(tile_r // _SUBLANES, _SUBLANES, _LANES),
                          axis=0)


# ----------------------------------------------------------------------------
# Wrapper-side packing + pallas_call plumbing
# ----------------------------------------------------------------------------
def _pack_boxes(decode_pred, decode_target):
    """Repack (N,4)+(N,4) boxes into a coordinate-major (8, r_total, 128) slab."""
    p = jnp.asarray(decode_pred, jnp.float32)
    t = jnp.asarray(decode_target, jnp.float32)
    n = p.shape[0]

    rows = pl.cdiv(n, _LANES)
    rows = max(_SUBLANES, ((rows + _SUBLANES - 1) // _SUBLANES) * _SUBLANES)
    if rows >= 2 * _SUBLANES:
        # >= 2 tiles so the "parallel" grid axis feeds both v7x TensorCores;
        # cap at 1024 rows (4 MiB block) for default scoped-VMEM safety.
        tile_r = min(_MAX_TILE_R, max(_SUBLANES,
                                      ((rows // 2) // _SUBLANES) * _SUBLANES))
    else:
        tile_r = rows
    r_total = ((rows + tile_r - 1) // tile_r) * tile_r
    num_tiles = r_total // tile_r
    n_pad = r_total * _LANES

    # Coordinate-major repack; pad the trailing (box) axis of the (8, N) view.
    # INVARIANT: pad value must be exactly 0.0 -> padded-box loss is exactly 1.0
    # (overlap 0 / union eps), which the sum-path correction relies on.
    coords = jnp.concatenate([p, t], axis=1).T                  # (8, N)
    coords = jnp.pad(coords, ((0, 0), (0, n_pad - n)))          # zeros
    packed = coords.reshape(8, r_total, _LANES)
    return packed, int(tile_r), int(r_total), int(num_tiles), int(n_pad), int(n)


def _b4iou_xla_per_box(decode_pred, decode_target, eps):
    """Pure-XLA reference / small-N fallback (same math as the kernel)."""
    dp = jnp.asarray(decode_pred, jnp.float32)
    dt = jnp.asarray(decode_target, jnp.float32)
    ap = (dp[:, 2] - dp[:, 0]) * (dp[:, 3] - dp[:, 1])
    at = (dt[:, 2] - dt[:, 0]) * (dt[:, 3] - dt[:, 1])
    w = jnp.maximum(jnp.minimum(dp[:, 2], dt[:, 2]) -
                    jnp.maximum(dp[:, 0], dt[:, 0]), 0.0)
    h = jnp.maximum(jnp.minimum(dp[:, 3], dt[:, 3]) -
                    jnp.maximum(dp[:, 1], dt[:, 1]), 0.0)
    ov = w * h
    ious = ov / jnp.maximum(ap + at - ov, eps)
    hi = _C1 * jnp.exp(ious * _LN_BASE) - 2.0 * ious + (2.0 - _C2)
    return jnp.where(ious < 0.25, 1.0 - ious, hi)


def b4iou_per_box(decode_pred, decode_target, eps=1e-6, force_pallas=False):
    """Per-box B4-IoU loss, shape (N,)."""
    n = decode_pred.shape[0]
    if n < _XLA_FALLBACK_N and not force_pallas:
        return _b4iou_xla_per_box(decode_pred, decode_target, eps)

    packed, tile_r, r_total, num_tiles, _, _ = _pack_boxes(decode_pred,
                                                           decode_target)
    kernel = functools.partial(_b4iou_perbox_kernel, eps=float(eps))
    loss_blocks = pl.pallas_call(
        kernel,
        grid=(num_tiles,),
        out_shape=jax.ShapeDtypeStruct((r_total, _LANES), jnp.float32),
        in_specs=[pl.BlockSpec((8, tile_r, _LANES), lambda i: (0, i, 0))],
        out_specs=pl.BlockSpec((tile_r, _LANES), lambda i: (i, 0)),
        compiler_params=pltpu.CompilerParams(dimension_semantics=("parallel",)),
    )(packed)
    return loss_blocks.reshape(-1)[:n]


def b4iou_sum(decode_pred, decode_target, eps=1e-6, force_pallas=False):
    """Sum over boxes of the B4-IoU loss (scalar)."""
    n = decode_pred.shape[0]
    if n < _XLA_FALLBACK_N and not force_pallas:
        return _b4iou_xla_per_box(decode_pred, decode_target, eps).sum()

    packed, tile_r, _, num_tiles, n_pad, n = _pack_boxes(decode_pred,
                                                         decode_target)
    kernel = functools.partial(_b4iou_sum_kernel, eps=float(eps),
                               tile_r=int(tile_r))
    psums = pl.pallas_call(
        kernel,
        grid=(num_tiles,),
        out_shape=jax.ShapeDtypeStruct((num_tiles, _SUBLANES, _LANES),
                                       jnp.float32),
        in_specs=[pl.BlockSpec((8, tile_r, _LANES), lambda i: (0, i, 0))],
        out_specs=pl.BlockSpec((1, _SUBLANES, _LANES), lambda i: (i, 0, 0)),
        compiler_params=pltpu.CompilerParams(dimension_semantics=("parallel",)),
    )(packed)
    # Each padded (all-zero) box contributes exactly 1.0 -> subtract them.
    return jnp.sum(psums) - float(n_pad - n)


# ----------------------------------------------------------------------------
# Module (weighted_loss reduction semantics, forward-pass only)
# ----------------------------------------------------------------------------
class B4IoULoss:
    """JAX/Pallas re-implementation of the PyTorch B4IoULoss module."""

    def __init__(self, alpha=0.5, gamma=1.5, beta=1.0, eps=1e-6,
                 reduction='mean', loss_weight=1.0, force_pallas=False):
        self.alpha = alpha
        self.gamma = gamma
        self.beta = beta
        self.eps = eps
        self.reduction = reduction
        self.loss_weight = loss_weight
        self.force_pallas = force_pallas

    def __call__(self, encode_decode_preds, encode_decode_targets,
                 weight=None, avg_factor=None, reduction_override=None):
        assert len(encode_decode_preds) == len(encode_decode_targets) == 2
        encode_pred, decode_pred = encode_decode_preds
        _, decode_target = encode_decode_targets

        # TODO(synk): this early-exit concretizes a traced value, so it only
        # works eagerly (matches the PyTorch control flow, not jit-safe).
        if weight is not None and not bool(jnp.any(weight > 0)):
            return (encode_pred * weight).sum()

        assert reduction_override in (None, 'none', 'mean', 'sum')
        reduction = reduction_override if reduction_override else self.reduction

        if weight is not None and weight.ndim > 1:
            assert weight.shape == encode_pred.shape
            weight = weight.mean(-1)

        n = decode_pred.shape[0]

        # Fast path: no weight, mean/sum reduction -> sum-only kernel (no dense
        # per-box loss materialized at all).
        if weight is None and reduction in ('mean', 'sum'):
            total = b4iou_sum(decode_pred, decode_target, eps=self.eps,
                              force_pallas=self.force_pallas)
            if reduction == 'sum':
                if avg_factor is not None:
                    raise ValueError(
                        'avg_factor can not be used with reduction="sum"')
                return self.loss_weight * total
            denom = avg_factor if avg_factor is not None else n
            return self.loss_weight * total / denom

        # General path: per-box kernel + thin plain-JAX reduction glue.
        per_box = b4iou_per_box(decode_pred, decode_target, eps=self.eps,
                                force_pallas=self.force_pallas)
        if weight is not None:
            per_box = per_box * weight
        if reduction == 'none':
            return self.loss_weight * per_box
        if reduction == 'sum':
            return self.loss_weight * per_box.sum()
        # reduction == 'mean'
        if avg_factor is None:
            return self.loss_weight * per_box.mean()
        return self.loss_weight * per_box.sum() / avg_factor


# ----------------------------------------------------------------------------
# Self-test
# ----------------------------------------------------------------------------
def _make_boxes(key, n):
    k1, k2 = jax.random.split(key)
    xy = jax.random.uniform(k1, (n, 2), jnp.float32, 0.0, 64.0)
    wh = jax.random.uniform(k2, (n, 2), jnp.float32, 1.0, 16.0)
    return jnp.concatenate([xy, xy + wh], axis=-1)  # valid (x1,y1,x2,y2)


if __name__ == "__main__":
    key = jax.random.PRNGKey(0)
    k_p, k_j, k_e1, k_e2, k_w = jax.random.split(key, 5)

    N = 2500  # multi-tile + padding-correction path (3 grid steps, 572 pad boxes)
    decode_pred = _make_boxes(k_p, N)
    # targets = jittered preds so IoUs span both loss branches
    jitter = jax.random.uniform(k_j, (N, 4), jnp.float32, -3.0, 3.0)
    decode_target = decode_pred + jitter
    tx1 = jnp.minimum(decode_target[:, 0], decode_target[:, 2] - 1e-3)
    ty1 = jnp.minimum(decode_target[:, 1], decode_target[:, 3] - 1e-3)
    decode_target = jnp.stack([tx1, ty1, decode_target[:, 2],
                               decode_target[:, 3]], axis=-1)

    # encode (delta) preds/targets: only used by the zero-weight early-exit path.
    encode_pred = jax.random.normal(k_e1, (N, 4), jnp.float32)
    encode_target = jax.random.normal(k_e2, (N, 4), jnp.float32)
    weight = jax.random.uniform(k_w, (N,), jnp.float32, 0.5, 1.5)

    # Force the Pallas kernels (bypass the small-N XLA fallback) for testing.
    loss_mod = B4IoULoss(reduction='mean', loss_weight=1.0, force_pallas=True)

    out_mean = loss_mod((encode_pred, decode_pred), (encode_target, decode_target))
    out_sum = loss_mod((encode_pred, decode_pred), (encode_target, decode_target),
                       reduction_override='sum')
    out_none = loss_mod((encode_pred, decode_pred), (encode_target, decode_target),
                        reduction_override='none')
    out_wmean = loss_mod((encode_pred, decode_pred), (encode_target, decode_target),
                         weight=weight)

    # Small-N XLA fallback path (default module config).
    loss_mod_fb = B4IoULoss(reduction='mean', loss_weight=1.0)
    out_mean_fb = loss_mod_fb((encode_pred, decode_pred),
                              (encode_target, decode_target))

    jax.block_until_ready((out_mean, out_sum, out_none, out_wmean, out_mean_fb))

    # Pure-JAX reference of the same math.
    ref_pb = _b4iou_xla_per_box(decode_pred, decode_target, 1e-6)
    assert jnp.allclose(out_none, ref_pb, rtol=1e-4, atol=1e-5)
    assert jnp.allclose(out_mean, ref_pb.mean(), rtol=1e-4, atol=1e-5), \
        (out_mean, ref_pb.mean())
    assert jnp.allclose(out_sum, ref_pb.sum(), rtol=1e-4, atol=1e-3), \
        (out_sum, ref_pb.sum())
    assert jnp.allclose(out_wmean, (ref_pb * weight).mean(), rtol=1e-4, atol=1e-5)
    assert jnp.allclose(out_mean_fb, ref_pb.mean(), rtol=1e-4, atol=1e-5)

    # TODO(synk): non-default weight / avg_factor reduction paths are thin
    # plain-JAX glue on the kernel's per-box output, not fused in-kernel.
    print("KERNEL_OK")
</pallas_src>

<mosaic_0001>
module attributes {stable_mosaic.version = 11 : i64} {
  func.func @_b4iou_sum_kernel(%arg0: i32, %arg1: memref<8x8x128xf32, #tpu.memory_space<vmem>>, %arg2: memref<1x8x128xf32, #tpu.memory_space<vmem>>) attributes {dimension_semantics = [#tpu.dimension_semantics<parallel>], iteration_bounds = array<i64: 3>, scalar_prefetch = 0 : i64, scratch_operands = 0 : i64, tpu.core_type = #tpu.core_type<tc>, window_params = [{transform_indices = @transform_0, window_bounds = array<i64: 8, 8, 128>}, {transform_indices = @transform_1, window_bounds = array<i64: 1, 8, 128>}]} {
    %c0 = arith.constant 0 : index
    %c0_0 = arith.constant 0 : index
    %c0_1 = arith.constant 0 : index
    %0 = vector.load %arg1[%c0, %c0_0, %c0_1] : memref<8x8x128xf32, #tpu.memory_space<vmem>>, vector<1x8x128xf32>
    %1 = vector.shape_cast %0 : vector<1x8x128xf32> to vector<8x128xf32>
    %c1 = arith.constant 1 : index
    %c0_2 = arith.constant 0 : index
    %c0_3 = arith.constant 0 : index
    %2 = vector.load %arg1[%c1, %c0_2, %c0_3] : memref<8x8x128xf32, #tpu.memory_space<vmem>>, vector<1x8x128xf32>
    %3 = vector.shape_cast %2 : vector<1x8x128xf32> to vector<8x128xf32>
    %c2 = arith.constant 2 : index
    %c0_4 = arith.constant 0 : index
    %c0_5 = arith.constant 0 : index
    %4 = vector.load %arg1[%c2, %c0_4, %c0_5] : memref<8x8x128xf32, #tpu.memory_space<vmem>>, vector<1x8x128xf32>
    %5 = vector.shape_cast %4 : vector<1x8x128xf32> to vector<8x128xf32>
    %c3 = arith.constant 3 : index
    %c0_6 = arith.constant 0 : index
    %c0_7 = arith.constant 0 : index
    %6 = vector.load %arg1[%c3, %c0_6, %c0_7] : memref<8x8x128xf32, #tpu.memory_space<vmem>>, vector<1x8x128xf32>
    %7 = vector.shape_cast %6 : vector<1x8x128xf32> to vector<8x128xf32>
    %c4 = arith.constant 4 : index
    %c0_8 = arith.constant 0 : index
    %c0_9 = arith.constant 0 : index
    %8 = vector.load %arg1[%c4, %c0_8, %c0_9] : memref<8x8x128xf32, #tpu.memory_space<vmem>>, vector<1x8x128xf32>
    %9 = vector.shape_cast %8 : vector<1x8x128xf32> to vector<8x128xf32>
    %c5 = arith.constant 5 : index
    %c0_10 = arith.constant 0 : index
    %c0_11 = arith.constant 0 : index
    %10 = vector.load %arg1[%c5, %c0_10, %c0_11] : memref<8x8x128xf32, #tpu.memory_space<vmem>>, vector<1x8x128xf32>
    %11 = vector.shape_cast %10 : vector<1x8x128xf32> to vector<8x128xf32>
    %c6 = arith.constant 6 : index
    %c0_12 = arith.constant 0 : index
    %c0_13 = arith.constant 0 : index
    %12 = vector.load %arg1[%c6, %c0_12, %c0_13] : memref<8x8x128xf32, #tpu.memory_space<vmem>>, vector<1x8x128xf32>
    %13 = vector.shape_cast %12 : vector<1x8x128xf32> to vector<8x128xf32>
    %c7 = arith.constant 7 : index
    %c0_14 = arith.constant 0 : index
    %c0_15 = arith.constant 0 : index
    %14 = vector.load %arg1[%c7, %c0_14, %c0_15] : memref<8x8x128xf32, #tpu.memory_space<vmem>>, vector<1x8x128xf32>
    %15 = vector.shape_cast %14 : vector<1x8x128xf32> to vector<8x128xf32>
    %16 = arith.subf %5, %1 : vector<8x128xf32>
    %17 = arith.subf %7, %3 : vector<8x128xf32>
    %18 = arith.mulf %16, %17 : vector<8x128xf32>
    %19 = arith.subf %13, %9 : vector<8x128xf32>
    %20 = arith.subf %15, %11 : vector<8x128xf32>
    %21 = arith.mulf %19, %20 : vector<8x128xf32>
    %22 = arith.minimumf %5, %13 : vector<8x128xf32>
    %23 = arith.maximumf %1, %9 : vector<8x128xf32>
    %24 = arith.subf %22, %23 : vector<8x128xf32>
    %cst = arith.constant 0.000000e+00 : f32
    %25 = vector.broadcast %cst : f32 to vector<8x128xf32>
    %26 = arith.maximumf %24, %25 : vector<8x128xf32>
    %27 = arith.minimumf %7, %15 : vector<8x128xf32>
    %28 = arith.maximumf %3, %11 : vector<8x128xf32>
    %29 = arith.subf %27, %28 : vector<8x128xf32>
    %cst_16 = arith.constant 0.000000e+00 : f32
    %30 = vector.broadcast %cst_16 : f32 to vector<8x128xf32>
    %31 = arith.maximumf %29, %30 : vector<8x128xf32>
    %32 = arith.mulf %26, %31 : vector<8x128xf32>
    %33 = arith.addf %18, %21 : vector<8x128xf32>
    %34 = arith.subf %33, %32 : vector<8x128xf32>
    %cst_17 = arith.constant 9.99999997E-7 : f32
    %35 = vector.broadcast %cst_17 : f32 to vector<8x128xf32>
    %36 = arith.maximumf %34, %35 : vector<8x128xf32>
    %37 = arith.divf %32, %36 : vector<8x128xf32>
    %cst_18 = arith.constant 1.000000e+00 : f32
    %38 = vector.broadcast %cst_18 : f32 to vector<8x128xf32>
    %39 = arith.subf %38, %37 : vector<8x128xf32>
    %cst_19 = arith.constant 0.924196243 : f32
    %40 = vector.broadcast %cst_19 : f32 to vector<8x128xf32>
    %41 = arith.mulf %37, %40 : vector<8x128xf32>
    %42 = math.exp %41 : vector<8x128xf32>
    %cst_20 = arith.constant 0.858800888 : f32
    %43 = vector.broadcast %cst_20 : f32 to vector<8x128xf32>
    %44 = arith.mulf %43, %42 : vector<8x128xf32>
    %cst_21 = arith.constant 2.000000e+00 : f32
    %45 = vector.broadcast %cst_21 : f32 to vector<8x128xf32>
    %46 = arith.mulf %45, %37 : vector<8x128xf32>
    %47 = arith.subf %44, %46 : vector<8x128xf32>
    %cst_22 = arith.constant -0.164042562 : f32
    %48 = vector.broadcast %cst_22 : f32 to vector<8x128xf32>
    %49 = arith.addf %47, %48 : vector<8x128xf32>
    %cst_23 = arith.constant 2.500000e-01 : f32
    %50 = vector.broadcast %cst_23 : f32 to vector<8x128xf32>
    %51 = arith.cmpf olt, %37, %50 : vector<8x128xf32>
    %52 = arith.select %51, %39, %49 : vector<8x128xi1>, vector<8x128xf32>
    %53 = vector.shape_cast %52 : vector<8x128xf32> to vector<1x8x128xf32>
    %cst_24 = arith.constant dense<0.000000e+00> : vector<8x128xf32>
    %54 = vector.multi_reduction <add>, %53, %cst_24 [0] : vector<1x8x128xf32> to vector<8x128xf32>
    %c0_25 = arith.constant 0 : index
    %c0_26 = arith.constant 0 : index
    %c0_27 = arith.constant 0 : index
    %55 = vector.load %arg2[%c0_25, %c0_26, %c0_27] : memref<1x8x128xf32, #tpu.memory_space<vmem>>, vector<1x8x128xf32>
    %56 = vector.shape_cast %55 : vector<1x8x128xf32> to vector<8x128xf32>
    %57 = vector.shape_cast %54 : vector<8x128xf32> to vector<1x8x128xf32>
    tpu.vector_store %arg2[%c0_25, %c0_26, %c0_27], %57 {strides = array<i32>} : memref<1x8x128xf32, #tpu.memory_space<vmem>>, vector<1x8x128xf32>,
    return
  }
  func.func @transform_0(%arg0: i32) -> (i32, i32, i32) {
    %c0_i32 = arith.constant 0 : i32
    %c0_i32_0 = arith.constant 0 : i32
    %c0_i32_1 = arith.constant 0 : i32
    return %c0_i32, %arg0, %c0_i32_0 : i32, i32, i32
  }
  func.func @transform_1(%arg0: i32) -> (i32, i32, i32) {
    %c0_i32 = arith.constant 0 : i32
    %c0_i32_0 = arith.constant 0 : i32
    %c0_i32_1 = arith.constant 0 : i32
    return %arg0, %c0_i32, %c0_i32_0 : i32, i32, i32
  }
}

</mosaic_0001>

<bundles_post_ra>
// kernel: tpu_custom_call.1
= control target key start
LH: loop header
LB: loop body
LE: loop exit
PB: predicated region body
PF: predicated region fallthrough
CT: control target
= control target key end

     0   :  { %6 = vsyncpa [#allocation3], 0  ;;  %s611_s0 = inlined_call_operand.hbm [shape: f32[8,24,128], index: 0, kind: input, shape index: {}]   ;;  %s612_s1 = inlined_call_operand.hbm [shape: f32[3,8,128], index: 1, kind: output, shape index: {}]  }
   0x1   :  { %8 = vsyncpa [#allocation3 + $0x1], 0 }
   0x2   :  { %9 = vsyncpa [#allocation4], 0 }
   0x3   :  { %11 = vsyncpa [#allocation4 + $0x1], 0  ;;  %s450_s6 = smov 0   ;;  %s452_s7 = smov 0  }
   0x4   :  { %s454_s8 = smov 0   ;;  %s456_s9 = smov 0  }
   0x5 LB: > { %s471_s10 = sadd.s32 4294967295, %s433_s9   ;;  %s265_s11 = sadd.s32 4294967294, %s433_s9   ;;  %s433_s9 = sphi %s456_s9, %s625_s9   ;;  %s429_s8 = sphi %s454_s8, %s624_s8   ;;  %s425_s7 = sphi %s452_s7, %s623_s7   ;;  %s421_s6 = sphi %s450_s6, %s622_s6  }
   0x6   : > { %s475_s12 = sadd.s32 1, %s433_s9   ;;  %s24_s13 = sadd.s32 1, %s429_s8 }
   0x7   : > { %s21_s14 = ssub.s32 %s433_s9, %s475_s12  ;;  %p31_p0 = scmp.ne.s32.totalorder %s429_s8, %s425_s7 }
   0x8   : > { %p22_p1 = scmp.eq.s32.totalorder %s21_s14, 0  ;;  %p32_p2 = scmp.eq.s32.totalorder %s433_s9, 0 }
   0x9   : > { %p37_p3 = scmp.ne.s32.totalorder %s425_s7, %s421_s6  ;;  %p38_p4 = scmp.eq.s32.totalorder %s471_s10, 0 }
   0xa   : > { %s487_s15 = scalar_select %p22_p1, %s429_s8, %s24_s13  }
   0xb   : > { %p489_p5 = por %p32_p2, %p31_p0  ;;  %p493_p6 = por %p38_p4, %p37_p3 }
   0xc   : > { %p61_p7 = scmp.eq.s32.totalorder %s471_s10, 2  ;;  %p67_p8 = scmp.eq.s32.totalorder %s265_s11, 2 }
   0xd   : > { %p296_p9 = scmp.lt.s32.totalorder %s433_s9, 3  ;;  %s87_s20 = sand.u32 1, %s429_s8  }
   0xe   : > { %p499_p10 = por %p61_p7, %p31_p0  ;;  %p503_p11 = por %p67_p8, %p37_p3 }
   0xf   : > { %s269_s21 = sshll.u32 %s433_s9, 7  ;;  %s268_s22 = sshll.u32 %s87_s20, 6 }
  0x10   : > { %s616_s18 = scalar_select %p499_p10, 1, 0 }
  0x11   : > { %s617_s19 = scalar_select %p503_p11, 1, 0 }
  0x12   : > { %s512_s25 = scalar_lea.hbm %s611_s0, %s269_s21  ;;  %s91_s26 = scalar_lea.vmem [#allocation2], %s268_s22 }
  0x13   : > { %s97_s27 = sshll.u32 %s91_s26, 4  ;;  %p516_p12 = pnand %p296_p9, %p489_p5  ;;  %s520_s27 = int_to_ptr.vmem [resolvable:$true] %s97_s27 }
  0x14   : > { %s523_s29 = scalar_lea.sflag [#allocation3], %s87_s20  ;;  %s337_s30 = scalar_lea.hbm %s512_s25, 1024 }
  0x15   : > { %p338_p0 = scmp.ne.s32.totalorder %s512_s25, %s337_s30  ;;  %p339_p1 = pneg %p516_p12 }
  0x16   : > { %s342_s4 = scalar_lea.hbm %s611_s0, 3072  ;;  %p343_p4 = scmp.lt.u32.totalorder %s512_s25, %s611_s0 }
  0x17   : > { %p340_p2 = pnand %p339_p1, %p338_p0  ;;  %p344_p5 = scmp.lt.u32.totalorder %s342_s4, %s337_s30 }
  0x18   : > { %p346_p8 = scmp.lt.u32.totalorder %s337_s30, %s512_s25 }
  0x19   : > { %p341_p3 = pneg %p340_p2  ;;  %p345_p7 = por %p344_p5, %p343_p4 }
  0x1b   : > { %p347_p9 = por %p346_p8, %p345_p7 }
  0x1d   : > { %p348_p13 = pnand %p347_p9, %p341_p3 }
  0x1f   : > { %351 = shalt.err (!%p348_p13)
}
  0x20   : > { %s352_s13 = scalar_lea.vmem %s520_s27, 1024  ;;  %s435_s14 = smov [#allocation2]  }
  0x21   : > { %p353_p0 = scmp.ne.s32.totalorder %s520_s27, %s352_s13  ;;  %s357_s16 = sshll.u32 %s435_s14, 4  ;;  %s358_s16 = int_to_ptr.vmem [resolvable:$false] %s357_s16 }
  0x22   : > { %s359_s20 = scalar_lea.vmem %s358_s16, 2048  ;;  %p360_p10 = scmp.lt.s32.totalorder %s520_s27, %s358_s16 }
  0x23   : > { %p355_p2 = pnand %p353_p0, %p339_p1  ;;  %p361_p4 = scmp.lt.s32.totalorder %s359_s20, %s352_s13 }
  0x25   : > { %p356_p11 = pneg %p355_p2  ;;  %p362_p5 = por %p361_p4, %p360_p10 }
  0x27   : > { %p363_p7 = pnand %p362_p5, %p356_p11 }
  0x29   : > { %366 = shalt.err (!%p363_p7)
}
  0x2a   : > { %s436_s21 = smov 384   ;;  %s437_s22 = smov 128  }
  0x2b   : > { %s438_s23 = smov 8   ;;  %p105_p13 = scmp.lt.s32.totalorder %s433_s9, 4 }
  0x2c   : > { %291 = dma.hbm_to_vmem [thread:$0]  (!%p516_p12), %s512_s25, 1024, %s520_s27, %s523_s29, %s436_s21, %s437_s22, %s438_s23  }
  0x2d   : > { %p619_p1 = scmp.ge.s32.totalorder %s433_s9, 1 }
  0x2f   : > { %p106_p3 = pnand %p619_p1, %p105_p13 }
  0x30   : > { %s555_s24 = sand.u32 (!%p106_p3), 1, %s425_s7  }
  0x31   : > { %109 = sbr.rel (%p106_p3) target bundleno = 122 (0x7a), region = 24  ;;  %s271_s26 = sshll.u32 (!%p106_p3), %s555_s24, 6 }
  0x32   : > { %s112_s30 = scalar_lea.sflag (!%p106_p3), [#allocation3], %s555_s24  ;;  %s115_s2 = scalar_lea.vmem (!%p106_p3), [#allocation2], %s271_s26 }
  0x38   : > { %412 = dma.done.wait (%p493_p6), %s112_s30, 1024  }
  0x39   : > { %414 = vsyncadd (%p493_p6), %s112_s30, 4294966272  ;;  %v134_v0 = vld [vmem:[%s115_s2] sm:$0xff]  ;;  %v273_v1 = vld [vmem:[%s115_s2 + $0x8] sm:$0xff]  ;;  %s272_s17 = sshll.u32 %s555_s24, 3  ;;  %s281_s28 = sshll.u32 %s471_s10, 7 }
  0x3a   : > { %v274_v2 = vld [vmem:[%s115_s2 + $0x10] sm:$0xff]  ;;  %v275_v3 = vld [vmem:[%s115_s2 + $0x18] sm:$0xff]  ;;  %v276_v4 = vld [vmem:[%s115_s2 + $0x20] sm:$0xff]  ;;  %s133_s25 = scalar_lea.vmem [#allocation5], %s272_s17  ;;  %s570_s4 = scalar_lea.hbm %s612_s1, %s281_s28 }
  0x3b   : > { %v277_v5 = vld [vmem:[%s115_s2 + $0x28] sm:$0xff]  ;;  %v149_v6 = vsub.f32 %v274_v2, %v134_v0  ;;  %v278_v7 = vld [vmem:[%s115_s2 + $0x30] sm:$0xff]  ;;  %v279_v8 = vld [vmem:[%s115_s2 + $0x38] sm:$0xff]  ;;  %v150_v9 = vsub.f32 %v275_v3, %v273_v1  ;;  %v156_v10 = vmax.f32 %v134_v0, %v276_v4  ;;  %s195_s27 = sshll.u32 %s133_s25, 4  ;;  %s182_s5 = scalar_lea.sflag [#allocation4], %s555_s24  ;;  %s565_s27 = int_to_ptr.vmem [resolvable:$true] %s195_s27 }
  0x3c   : > { %v160_v11 = vmax.f32 %v273_v1, %v277_v5  ;;  %v152_v12 = vsub.f32 %v278_v7, %v276_v4  ;;  %v153_v13 = vsub.f32 %v279_v8, %v277_v5  ;;  %v155_v14 = vmin.f32 %v274_v2, %v278_v7  ;;  %s367_s11 = scalar_lea.vmem %s565_s27, 128  ;;  %p620_p10 = scmp.ne.s32.totalorder %s616_s18, 0 }
  0x3d   : > { %v159_v15 = vmin.f32 %v275_v3, %v279_v8  ;;  %v151_v16 = vmul.f32 %v150_v9, %v149_v6  ;;  %p368_p6 = scmp.ne.s32.totalorder %s565_s27, %s367_s11  ;;  %s439_s10 = smov [#allocation5]  }
  0x3e   : > { %v154_v17 = vmul.f32 %v153_v13, %v152_v12  ;;  %v157_v18 = vsub.f32 %v155_v14, %v156_v10  ;;  %s371_s13 = sshll.u32 %s439_s10, 4  ;;  %s372_s13 = int_to_ptr.vmem [resolvable:$false] %s371_s13 }
  0x3f   : > { %v161_v19 = vsub.f32 %v159_v15, %v160_v11  ;;  %p369_p11 = pnand %p368_p6, %p620_p10  ;;  %s373_s14 = scalar_lea.vmem %s372_s13, 256 }
  0x40   : > { %v158_v20 = vmax.f32 %v157_v18, 0.0  ;;  %v164_v22 = vadd.f32 %v154_v17, %v151_v16  ;;  %p374_p8 = scmp.lt.s32.totalorder %s565_s27, %s372_s13  ;;  %p375_p9 = scmp.lt.s32.totalorder %s373_s14, %s367_s11 }
  0x41   : > { %v162_v21 = vmax.f32 %v161_v19, 0.0  ;;  %p370_p12 = pneg %p369_p11 }
  0x42   : > { %p376_p0 = por %p375_p9, %p374_p8 }
  0x43   : > { %v163_v23 = vmul.f32 %v162_v21, %v158_v20 }
  0x44   : > { %p377_p2 = pnand %p376_p0, %p370_p12 }
  0x45   : > { %v165_v24 = vsub.f32 %v164_v22, %v163_v23 }
  0x47   : > { %v166_v25 = vmax.f32 %v165_v24, 1e-06 }
  0x49   : > { %333 = vrcp.f32 %v166_v25 }
  0x53   : > { %v334_v26 = vpop.eup %333 }
  0x54   : > { %v168_v27 = vmul.f32 %v334_v26, %v163_v23 }
  0x56   : > { %v170_v28 = vmul.f32 0.92419624, %v168_v27  ;;  %v174_v30 = vmul.f32 2.0, %v168_v27  ;;  %v169_v33 = vsub.f32 1.0, %v168_v27  ;;  %vm177_vm0 = vcmp.lt.f32.partialorder %v168_v27, 0.25 }
  0x58   : > { %v171_v29 = vmul.f32 1.442695, %v170_v28 }
  0x5a   : > { %335 = vpow2.f32 %v171_v29 }
  0x64   : > { %v336_v31 = vpop.eup %335 }
  0x65   : > { %v173_v32 = vmul.f32 0.8588009, %v336_v31 }
  0x67   : > { %v175_v34 = vsub.f32 %v173_v32, %v174_v30 }
  0x69   : > { %v176_v35 = vadd.f32 -0.16404256, %v175_v34 }
  0x6b   : > { %v178_v36 = vsel %vm177_vm0, %v169_v33, %v176_v35 }
  0x6c   : > { %180 = vst [vmem:[%s133_s25] sm:$0xff] %v178_v36 }
  0x6d   : > { %380 = shalt.err (!%p377_p2)
}
  0x6e   : > { %s381_s16 = scalar_lea.hbm %s570_s4, 128  ;;  %s385_s22 = scalar_lea.hbm %s612_s1, 384 }
  0x6f   : > { %p382_p4 = scmp.ne.s32.totalorder %s570_s4, %s381_s16  ;;  %p386_p13 = scmp.lt.u32.totalorder %s570_s4, %s612_s1 }
  0x70   : > { %p387_p1 = scmp.lt.u32.totalorder %s385_s22, %s381_s16  ;;  %p389_p6 = scmp.lt.u32.totalorder %s381_s16, %s570_s4 }
  0x71   : > { %p383_p5 = pnand %p382_p4, %p620_p10 }
  0x72   : > { %p388_p3 = por %p387_p1, %p386_p13 }
  0x73   : > { %p384_p7 = pneg %p383_p5 }
  0x74   : > { %p390_p11 = por %p389_p6, %p388_p3 }
  0x76   : > { %p391_p12 = pnand %p390_p11, %p384_p7 }
  0x78   : > { %394 = shalt.err (!%p391_p12)
}
  0x79   : > { %286 = dma.vmem_to_hbm [thread:$0]  (%p620_p10), %s565_s27, 128, %s570_s4, %s182_s5  }
  0x7a PF: > { %p297_p8 = scmp.ge.s32.totalorder %s433_s9, 2  ;;  %s207_s26 = sand.u32 1, %s421_s6  }
  0x7b   : > { %p621_p9 = scmp.ne.s32.totalorder %s617_s19, 0  ;;  %s208_s30 = scalar_lea.sflag [#allocation4], %s207_s26 }
  0x7d   : > { %p293_p0 = pnand %p297_p8, %p621_p9 }
  0x7f   : > { %416 = dma.done.wait (!%p293_p0), %s208_s30, 128  }
  0x80   : > { %418 = vsyncadd (!%p293_p0), %s208_s30, 4294967168  ;;  %p14_p2 = scmp.ge.s32.totalorder %s475_s12, 5   ;;  %s622_s6 = smov %s425_s7 }
  0x81   : > { %s623_s7 = smov %s429_s8  ;;  %s624_s8 = smov %s487_s15 }
  0x82   : > { %s625_s9 = smov %s475_s12  ;;  %16 = sbr.rel (!%p14_p2) target bundleno = 5 (0x5), region = 76 }
  0x89   :  { %213 = vsyncpa [#allocation3], 1 }
  0x8a   :  { %215 = vsyncpa [#allocation3 + $0x1], 1 }
  0x8b   :  { %216 = vsyncpa [#allocation4], 1 }
  0x8c   :  { %218 = vsyncpa [#allocation4 + $0x1], 1 }

</bundles_post_ra>
